<compile_context>
chip_gen: v5e
topology: v5e:2x2
jax: 0.10.0
libtpu: 0.0.40
codegen_flags: <defaults>
</compile_context>

<pallas_src>
import functools

import jax
import jax.numpy as jnp
from jax.experimental import pallas as pl
from jax.experimental.pallas import tpu as pltpu


def _patch_embed_kernel(x_ref, w_ref, b_ref, o_ref):
    # One MXU matmul per (TM, K) x (K, E) tile: bf16 operands, f32 accumulate,
    # f32 bias broadcast-add, then cast to the output dtype.
    acc = jnp.dot(x_ref[...], w_ref[...], preferred_element_type=jnp.float32)
    o_ref[...] = (acc + b_ref[...]).astype(o_ref.dtype)


def _round_up(x: int, m: int) -> int:
    return (x + m - 1) // m * m


@functools.partial(jax.jit, static_argnames=("patch_size",))
def patch_embed(x, weight, bias, *, patch_size):
    """x: (N, C, H, W); weight: (E, C, P, P) (Conv2d layout); bias: (E,).

    Returns (N, (H//P)*(W//P), E), matching PatchEmbedder.forward.
    """
    N, C, H, W = x.shape
    E = weight.shape[0]
    P = patch_size
    assert H % P == 0 and W % P == 0
    hp, wp = H // P, W // P
    num_patches = hp * wp

    # --- glue: extract non-overlapping patches, feature order = (C, Ph, Pw) ---
    # (N, C, hp, P, wp, P) -> (N, hp, wp, C, P, P) -> (N*num_patches, C*P*P)
    # With allow_input_fusion below, XLA may fold this layout change into the
    # pallas_call's input DMA rather than materializing it in HBM.
    xp = x.reshape(N, C, hp, P, wp, P)
    xp = jnp.transpose(xp, (0, 2, 4, 1, 3, 5))
    xp = xp.reshape(N * num_patches, C * P * P)

    # Conv weight (E, C, P, P) -> (C*P*P, E); bias -> (1, E) f32 for broadcast.
    w2d = weight.reshape(E, C * P * P).T
    b2d = bias.reshape(1, E).astype(jnp.float32)

    M, K = xp.shape

    # bf16 MXU operands (f32 accumulation happens inside the kernel).
    xp = xp.astype(jnp.bfloat16)
    w2d = w2d.astype(jnp.bfloat16)

    # Tile M; W/bias stay resident (constant index_map).  TM=1024 keeps the
    # double-buffered footprint ~10-15 MiB for ViT-sized K/E, which fits every
    # generation's scoped VMEM, while being large enough to amortize the
    # ~0.35 us per-step overhead.  Small inputs collapse to a single tile.
    TM = min(1024, _round_up(M, 8))
    grid = (pl.cdiv(M, TM),)

    out = pl.pallas_call(
        _patch_embed_kernel,
        out_shape=jax.ShapeDtypeStruct((M, E), x.dtype),
        grid_spec=pl.GridSpec(
            grid=grid,
            in_specs=[
                pl.BlockSpec((TM, K), lambda i: (i, 0)),   # X: streamed over M
                pl.BlockSpec((K, E), lambda i: (0, 0)),    # W: resident
                pl.BlockSpec((1, E), lambda i: (0, 0)),    # bias: resident
            ],
            out_specs=pl.BlockSpec((TM, E), lambda i: (i, 0)),
        ),
        compiler_params=pltpu.CompilerParams(
            # M tiles are independent -> megacore sharding on v7x.
            dimension_semantics=("parallel",),
            # > default scoped limit, < v7x's 64 MiB physical VMEM.
            vmem_limit_bytes=48 * 1024 * 1024,
            # Let XLA fuse the patch-extraction transpose into input 0's DMA.
            allow_input_fusion=[True, False, False],
        ),
    )(xp, w2d, b2d)

    return out.reshape(N, num_patches, E)


if __name__ == "__main__":
    # Small shapes consistent with the module: batch=2, channels=4,
    # spatial=16, patch_size=4 -> 16 patches, embed_dim=32.
    N, C, H, W = 2, 4, 16, 16
    P = 4
    E = 32

    key = jax.random.PRNGKey(0)
    kx, kw, kb = jax.random.split(key, 3)

    x = jax.random.normal(kx, (N, C, H, W), dtype=jnp.float32)
    # Deterministic synthetic parameters (Conv2d-shaped: (E, C, P, P), (E,)).
    weight = jax.random.normal(kw, (E, C, P, P), dtype=jnp.float32) * 0.02
    bias = jax.random.normal(kb, (E,), dtype=jnp.float32) * 0.01

    out = patch_embed(x, weight, bias, patch_size=P)
    jax.block_until_ready(out)

    # Sanity check against a pure-JAX f32 reference of the same math.
    # (Looser tolerance because the kernel matmul runs with bf16 operands.)
    xp = jnp.transpose(x.reshape(N, C, H // P, P, W // P, P),
                       (0, 2, 4, 1, 3, 5)).reshape(N, -1, C * P * P)
    ref = xp @ weight.reshape(E, -1).T + bias
    assert out.shape == (N, (H // P) * (W // P), E)
    assert jnp.allclose(out, ref, atol=3e-2, rtol=3e-2)

    print("KERNEL_OK")
</pallas_src>

<mosaic_0001>
module attributes {stable_mosaic.version = 11 : i64} {
  func.func @_patch_embed_kernel(%arg0: i32, %arg1: memref<32x64xbf16, #tpu.memory_space<vmem>>, %arg2: memref<64x32xbf16, #tpu.memory_space<vmem>>, %arg3: memref<1x32xf32, #tpu.memory_space<vmem>>, %arg4: memref<32x32xf32, #tpu.memory_space<vmem>>) attributes {dimension_semantics = [#tpu.dimension_semantics<parallel>], iteration_bounds = array<i64: 1>, scalar_prefetch = 0 : i64, scratch_operands = 0 : i64, tpu.core_type = #tpu.core_type<tc>, window_params = [{transform_indices = @transform_0, window_bounds = array<i64: 32, 64>}, {pipeline_mode = #tpu.pipeline_mode<synchronous>, transform_indices = @transform_1, window_bounds = array<i64: 64, 32>}, {pipeline_mode = #tpu.pipeline_mode<synchronous>, transform_indices = @transform_2, window_bounds = array<i64: 1, 32>}, {transform_indices = @transform_3, window_bounds = array<i64: 32, 32>}]} {
    %c0 = arith.constant 0 : index
    %c0_0 = arith.constant 0 : index
    %0 = vector.load %arg1[%c0, %c0_0] : memref<32x64xbf16, #tpu.memory_space<vmem>>, vector<32x64xbf16>
    %c0_1 = arith.constant 0 : index
    %c0_2 = arith.constant 0 : index
    %1 = vector.load %arg2[%c0_1, %c0_2] : memref<64x32xbf16, #tpu.memory_space<vmem>>, vector<64x32xbf16>
    %cst = arith.constant dense<0.000000e+00> : vector<32x32xf32>
    %2 = tpu.matmul %0, %1, %cst {dimension_numbers = #tpu.dot_dimension_numbers<[1], [0], [0], [1], [0, 0, 1, 1], [], []>} : vector<32x64xbf16>, vector<64x32xbf16>, vector<32x32xf32> -> vector<32x32xf32>
    %c0_3 = arith.constant 0 : index
    %c0_4 = arith.constant 0 : index
    %3 = vector.load %arg3[%c0_3, %c0_4] : memref<1x32xf32, #tpu.memory_space<vmem>>, vector<1x32xf32>
    %4 = vector.broadcast %3 : vector<1x32xf32> to vector<32x32xf32>
    %5 = arith.addf %2, %4 : vector<32x32xf32>
    %c0_5 = arith.constant 0 : index
    %c0_6 = arith.constant 0 : index
    %6 = vector.load %arg4[%c0_5, %c0_6] : memref<32x32xf32, #tpu.memory_space<vmem>>, vector<32x32xf32>
    tpu.vector_store %arg4[%c0_5, %c0_6], %5 {strides = array<i32>} : memref<32x32xf32, #tpu.memory_space<vmem>>, vector<32x32xf32>,
    return
  }
  func.func @transform_0(%arg0: i32) -> (i32, i32) {
    %c0_i32 = arith.constant 0 : i32
    %c0_i32_0 = arith.constant 0 : i32
    return %arg0, %c0_i32 : i32, i32
  }
  func.func @transform_1(%arg0: i32) -> (i32, i32) {
    %c0_i32 = arith.constant 0 : i32
    %c0_i32_0 = arith.constant 0 : i32
    %c0_i32_1 = arith.constant 0 : i32
    return %c0_i32, %c0_i32_0 : i32, i32
  }
  func.func @transform_2(%arg0: i32) -> (i32, i32) {
    %c0_i32 = arith.constant 0 : i32
    %c0_i32_0 = arith.constant 0 : i32
    %c0_i32_1 = arith.constant 0 : i32
    return %c0_i32, %c0_i32_0 : i32, i32
  }
  func.func @transform_3(%arg0: i32) -> (i32, i32) {
    %c0_i32 = arith.constant 0 : i32
    %c0_i32_0 = arith.constant 0 : i32
    return %arg0, %c0_i32 : i32, i32
  }
}

</mosaic_0001>

<bundles_post_ra>
// kernel: patch_embed.1
= control target key start
LH: loop header
LB: loop body
LE: loop exit
PB: predicated region body
PF: predicated region fallthrough
CT: control target
= control target key end

     0   :  { %s232_s0 = inlined_call_operand.vmem [shape: bf16[32,64], index: 0, kind: input, shape index: {}]   ;;  %s233_s1 = inlined_call_operand.vmem [shape: bf16[64,32], index: 1, kind: input, shape index: {}]   ;;  %s234_s2 = inlined_call_operand.vmem [shape: f32[1,32], index: 2, kind: input, shape index: {}]   ;;  %s235_s3 = inlined_call_operand.hbm [shape: f32[32,32], index: 3, kind: output, shape index: {}]  }
   0x1   :  { %v146_v0 = vld [vmem:[%s233_s1 + $0x18] sm:$0xff]  ;;  %v145_v1 = vld [vmem:[%s233_s1 + $0x10] sm:$0xff] }
   0x2   :  { %77 = vmatpush.bf16.msra.mxu0 %v146_v0  ;;  %147 = vmatpush.bf16.msra.mxu1 %v146_v0 }
   0x3   :  { %8 = vsyncpa [#allocation3], 0  ;;  %v144_v2 = vld [vmem:[%s233_s1 + $0x8] sm:$0xff]  ;;  %v143_v3 = vld [vmem:[%s233_s1] sm:$0xff]  ;;  %vm66_vm0 = vcmask 523264   ;;  %vm92_vm1 = vcmask 261120  }
   0x4   :  { %v141_v4 = vld [vmem:[%s232_s0] sm:$0xff]  ;;  %v142_v5 = vld [vmem:[%s232_s0 + $0x8] sm:$0xff]  ;;  %s181_s1 = smov [#allocation2]   ;;  %s103_s28 = sshll.u32 %s235_s3, 4  ;;  %s104_s28 = int_to_ptr.hbm [resolvable:$true] %s103_s28 }
   0x5   :  { %v154_v6 = vld [vmem:[%s234_s2] ss:$0 sm:$0xff]  ;;  %s101_s0 = sshll.u32 %s181_s1, 4  ;;  %s182_s2 = smov 128   ;;  %s102_s0 = int_to_ptr.vmem [resolvable:$true] %s101_s0 }
   0x6   :  { %78 = vmatpush.bf16.msra.mxu0 %v145_v1  ;;  %148 = vmatpush.bf16.msra.mxu1 %v145_v1  ;;  %s183_s29 = smov 8  }
   0xa   :  { %79 = vmatpush.bf16.msra.mxu0 %v144_v2  ;;  %149 = vmatpush.bf16.msra.mxu1 %v144_v2 }
   0xe   :  { %80 = vmatpush.bf16.msra.mxu0 %v143_v3  ;;  %150 = vmatpush.bf16.msra.mxu1 %v143_v3 }
  0x11   :  { %139 = vmatmul.msk.bf16.vlgmr.msra.gmra.mxu0 %vm66_vm0, %v141_v4  ;;  %140 = vmatmul.msk.bf16.vlgmr.msra.gmra.mxu1 %vm66_vm0, %v142_v5 }
  0x8e   :  { %v82_v7 = vpop.f32.mrf.mxu0  ;;  %v87_v8 = vpop.f32.mrf.mxu1 }
  0x8f   :  { %v83_v9 = vadd.f32 %v154_v6, %v82_v7  ;;  %v88_v10 = vadd.f32 %v154_v6, %v87_v8 }
  0x91   :  { %93 = vst.msk [vmem:[#allocation2] sm:$0xff] %vm92_vm1, %v83_v9 }
  0x92   :  { %95 = vst.msk [vmem:[#allocation2 + $0x10] sm:$0xff] %vm92_vm1, %v88_v10 }
  0x96   :  { %v84_v11 = vpop.f32.mrf.mxu0  ;;  %v89_v12 = vpop.f32.mrf.mxu1 }
  0x97   :  { %v85_v13 = vadd.f32 %v154_v6, %v84_v11  ;;  %v90_v14 = vadd.f32 %v154_v6, %v89_v12 }
  0x99   :  { %94 = vst.msk [vmem:[#allocation2 + $0x8] sm:$0xff] %vm92_vm1, %v85_v13 }
  0x9a   :  { %96 = vst.msk [vmem:[#allocation2 + $0x18] sm:$0xff] %vm92_vm1, %v90_v14 }
  0x9b   :  { %109 = dma.vmem_to_hbm [thread:$0]  %s102_s0, 512, %s104_s28, [#allocation3], %s182_s2, %s182_s2, %s183_s29  }
  0x9c   :  { %179 = dma.done.wait [#allocation3], 512  }
  0x9d   :  { %180 = vsyncadd [#allocation3], 4294966784 }
  0x9e   :  { %114 = vsyncpa [#allocation3], 1 }

</bundles_post_ra>
